<compile_context>
chip_gen: v7x
topology: tpu7x:2x2x1
jax: 0.10.0
libtpu: 0.0.40
codegen_flags: <defaults>
</compile_context>

<pallas_src>
import functools

import jax
import jax.numpy as jnp
from jax.experimental import pallas as pl
from jax.experimental.pallas import tpu as pltpu


# ----------------------------------------------------------------------------
# Fused kernel: token shift (sub-slice row copies into VMEM scratch) -> Linear
# ----------------------------------------------------------------------------
def _fused_shift_linear_kernel(x_ref, w_ref, b_ref, o_ref, xs_ref, *,
                               frames, n_per_frame, dim):
    """One grid step = one batch element.

    x_ref : (1, T, D)  input tokens for batch i (input dtype, streamed)
    w_ref : (D, D)     bf16 weight, VMEM-resident (constant block index)
    b_ref : (1, D)     f32 bias, VMEM-resident
    o_ref : (1, T, D)  output tile (input dtype)
    xs_ref: (T, D)     bf16 VMEM scratch holding the token-shifted activation
    """
    n = n_per_frame
    c = dim // 3
    body = frames * n                        # = T - 1 (tokens after cls)

    x = x_ref[0].astype(xs_ref.dtype)        # (T, D) -> bf16

    # Pass-through copy: cls row, chunk 1 ([c, 2c)), remainder ([3c, D)) and
    # the rows the two shifted chunks overwrite below.
    xs_ref[...] = x

    # Chunk 0 (lanes [0, c)): frame shift -1 -> out[f] = in[f + 1], last frame zeroed.
    if frames > 1:
        xs_ref[1:1 + body - n, 0:c] = x[1 + n:1 + body, 0:c]
    xs_ref[1 + body - n:1 + body, 0:c] = jnp.zeros((n, c), xs_ref.dtype)

    # Chunk 2 (lanes [2c, 3c)): frame shift +1 -> out[f] = in[f - 1], first frame zeroed.
    xs_ref[1:1 + n, 2 * c:3 * c] = jnp.zeros((n, c), xs_ref.dtype)
    if frames > 1:
        xs_ref[1 + n:1 + body, 2 * c:3 * c] = x[1:1 + body - n, 2 * c:3 * c]

    # Linear: bf16 x bf16 on the MXU, f32 accumulation, bias added in f32.
    acc = jnp.dot(xs_ref[...], w_ref[...], preferred_element_type=jnp.float32)
    o_ref[0] = (acc + b_ref[...].astype(jnp.float32)).astype(o_ref.dtype)


# ----------------------------------------------------------------------------
# Wrapper: PreTokenShift(frames, Linear).forward(x) == shift(x) @ W + b
# ----------------------------------------------------------------------------
def pre_token_shift(x, frames, w, bias):
    b, t, d = x.shape
    assert d >= 3, "feature dim must allow 3 chunks"
    n = (t - 1) // frames
    assert n >= 1 and 1 + frames * n == t, "token count must be 1 + frames * n"
    assert w.shape == (d, d)

    w_bf = w.astype(jnp.bfloat16)                              # tiny one-off cast
    bias2 = jnp.asarray(bias).reshape(1, d).astype(jnp.float32)

    kernel = functools.partial(
        _fused_shift_linear_kernel, frames=frames, n_per_frame=n, dim=d)

    in_bytes = jnp.dtype(x.dtype).itemsize
    # Per-core VMEM: double-buffered x & out blocks, bf16 xs scratch, bf16 x
    # temporary, f32 matmul accumulator temp, double-buffered resident W + bias.
    vmem_est = (t * d * (2 * in_bytes + 2 * in_bytes + 2 + 2 + 4)
                + 2 * d * d * 2 + 2 * d * 4)
    vmem_limit = int(min(48 * 2 ** 20, max(32 * 2 ** 20, 2 * vmem_est)))

    out = pl.pallas_call(
        kernel,
        out_shape=jax.ShapeDtypeStruct((b, t, d), x.dtype),
        grid=(b,),
        in_specs=[
            pl.BlockSpec((1, t, d), lambda i: (i, 0, 0)),   # streamed per batch
            pl.BlockSpec((d, d), lambda i: (0, 0)),         # resident weight (fetched once)
            pl.BlockSpec((1, d), lambda i: (0, 0)),         # resident bias
        ],
        out_specs=pl.BlockSpec((1, t, d), lambda i: (i, 0, 0)),
        scratch_shapes=[pltpu.VMEM((t, d), jnp.bfloat16)],
        compiler_params=pltpu.CompilerParams(
            dimension_semantics=("parallel",),
            vmem_limit_bytes=vmem_limit,
        ),
        cost_estimate=pl.CostEstimate(
            flops=2 * b * t * d * d,
            transcendentals=0,
            bytes_accessed=(2 * b * t * d * in_bytes + d * d * 2 + d * 4),
        ),
    )(x, w_bf, bias2)
    return out


# ----------------------------------------------------------------------------
# Pure-JAX reference (same bf16 operands, f32 accumulation) for verification
# ----------------------------------------------------------------------------
def _shift_tokens_ref(x, frames):
    b, t, d = x.shape
    n = (t - 1) // frames
    cls_x, body = x[:, :1], x[:, 1:].reshape(b, frames, n, d)
    c = d // 3
    z = jnp.zeros((b, 1, n, c), x.dtype)
    c0 = jnp.concatenate([body[:, 1:, :, 0:c], z], axis=1)            # shift -1 over frames
    c2 = jnp.concatenate([z, body[:, :-1, :, 2 * c:3 * c]], axis=1)   # shift +1 over frames
    y = jnp.concatenate([c0, body[..., c:2 * c], c2, body[..., 3 * c:]], axis=-1)
    return jnp.concatenate([cls_x, y.reshape(b, frames * n, d)], axis=1)


def _ref_pre_token_shift(x, frames, w, bias):
    y = _shift_tokens_ref(x, frames)
    out = jnp.einsum("btd,de->bte",
                     y.astype(jnp.bfloat16), w.astype(jnp.bfloat16),
                     preferred_element_type=jnp.float32)
    out = out + jnp.asarray(bias).reshape(1, 1, -1).astype(jnp.float32)
    return out.astype(x.dtype)


if __name__ == "__main__":
    key = jax.random.PRNGKey(0)
    configs = [
        # (B, frames, tokens per frame, D)
        (2, 4, 16, 128),   # lane-aligned D, D % 3 remainder lanes pass through
        (2, 3, 8, 200),    # D not a multiple of 128, remainder lanes
        (1, 1, 5, 96),     # single frame -> both shifted chunks fully zeroed
    ]
    for (B, F, N, D) in configs:
        T = 1 + F * N
        key, k_x, k_w, k_b = jax.random.split(key, 4)
        x = jax.random.normal(k_x, (B, T, D), dtype=jnp.float32)
        w = jax.random.normal(k_w, (D, D), dtype=jnp.float32) * 0.05
        bias = jax.random.normal(k_b, (D,), dtype=jnp.float32) * 0.01

        out = jax.block_until_ready(pre_token_shift(x, F, w, bias))
        ref = _ref_pre_token_shift(x, F, w, bias)
        assert out.shape == (B, T, D)
        err = float(jnp.max(jnp.abs(out - ref)))
        assert jnp.allclose(out, ref, atol=2e-3, rtol=2e-3), ((B, F, N, D), err)

    print("KERNEL_OK")
</pallas_src>

<mosaic_0001>
module attributes {stable_mosaic.version = 11 : i64} {
  func.func @_fused_shift_linear_kernel(%arg0: i32, %arg1: memref<1x65x128xf32, #tpu.memory_space<vmem>>, %arg2: memref<128x128xbf16, #tpu.memory_space<vmem>>, %arg3: memref<1x128xf32, #tpu.memory_space<vmem>>, %arg4: memref<1x65x128xf32, #tpu.memory_space<vmem>>, %arg5: memref<65x128xbf16, #tpu.memory_space<vmem>>) attributes {dimension_semantics = [#tpu.dimension_semantics<parallel>], iteration_bounds = array<i64: 2>, scalar_prefetch = 0 : i64, scratch_operands = 1 : i64, tpu.core_type = #tpu.core_type<tc>, window_params = [{transform_indices = @transform_0, window_bounds = array<i64: 1, 65, 128>}, {pipeline_mode = #tpu.pipeline_mode<synchronous>, transform_indices = @transform_1, window_bounds = array<i64: 128, 128>}, {pipeline_mode = #tpu.pipeline_mode<synchronous>, transform_indices = @transform_2, window_bounds = array<i64: 1, 128>}, {transform_indices = @transform_3, window_bounds = array<i64: 1, 65, 128>}]} {
    %c0 = arith.constant 0 : index
    %c0_0 = arith.constant 0 : index
    %c0_1 = arith.constant 0 : index
    %0 = vector.load %arg1[%c0, %c0_0, %c0_1] : memref<1x65x128xf32, #tpu.memory_space<vmem>>, vector<1x65x128xf32>
    %1 = vector.shape_cast %0 : vector<1x65x128xf32> to vector<65x128xf32>
    %2 = arith.truncf %1 : vector<65x128xf32> to vector<65x128xbf16>
    %c0_2 = arith.constant 0 : index
    %c0_3 = arith.constant 0 : index
    %3 = vector.load %arg5[%c0_2, %c0_3] : memref<65x128xbf16, #tpu.memory_space<vmem>>, vector<65x128xbf16>
    tpu.vector_store %arg5[%c0_2, %c0_3], %2 {strides = array<i32>} : memref<65x128xbf16, #tpu.memory_space<vmem>>, vector<65x128xbf16>,
    %4 = vector.extract_strided_slice %2 {offsets = [17, 0], sizes = [48, 42], strides = [1, 1]} : vector<65x128xbf16> to vector<48x42xbf16>
    %c1 = arith.constant 1 : index
    %c0_4 = arith.constant 0 : index
    %5 = vector.load %arg5[%c1, %c0_4] : memref<65x128xbf16, #tpu.memory_space<vmem>>, vector<48x42xbf16>
    tpu.vector_store %arg5[%c1, %c0_4], %4 {strides = array<i32>} : memref<65x128xbf16, #tpu.memory_space<vmem>>, vector<48x42xbf16>,
    %cst = arith.constant 0.000000e+00 : bf16
    %6 = vector.broadcast %cst : bf16 to vector<16x42xbf16>
    %c49 = arith.constant 49 : index
    %c0_5 = arith.constant 0 : index
    %7 = vector.load %arg5[%c49, %c0_5] : memref<65x128xbf16, #tpu.memory_space<vmem>>, vector<16x42xbf16>
    tpu.vector_store %arg5[%c49, %c0_5], %6 {strides = array<i32>} : memref<65x128xbf16, #tpu.memory_space<vmem>>, vector<16x42xbf16>,
    %cst_6 = arith.constant 0.000000e+00 : bf16
    %8 = vector.broadcast %cst_6 : bf16 to vector<16x42xbf16>
    %c1_7 = arith.constant 1 : index
    %c84 = arith.constant 84 : index
    %9 = vector.load %arg5[%c1_7, %c84] : memref<65x128xbf16, #tpu.memory_space<vmem>>, vector<16x42xbf16>
    tpu.vector_store %arg5[%c1_7, %c84], %8 {strides = array<i32>} : memref<65x128xbf16, #tpu.memory_space<vmem>>, vector<16x42xbf16>,
    %10 = vector.extract_strided_slice %2 {offsets = [1, 84], sizes = [48, 42], strides = [1, 1]} : vector<65x128xbf16> to vector<48x42xbf16>
    %c17 = arith.constant 17 : index
    %c84_8 = arith.constant 84 : index
    %11 = vector.load %arg5[%c17, %c84_8] : memref<65x128xbf16, #tpu.memory_space<vmem>>, vector<48x42xbf16>
    tpu.vector_store %arg5[%c17, %c84_8], %10 {strides = array<i32>} : memref<65x128xbf16, #tpu.memory_space<vmem>>, vector<48x42xbf16>,
    %c0_9 = arith.constant 0 : index
    %c0_10 = arith.constant 0 : index
    %12 = vector.load %arg5[%c0_9, %c0_10] : memref<65x128xbf16, #tpu.memory_space<vmem>>, vector<65x128xbf16>
    %c0_11 = arith.constant 0 : index
    %c0_12 = arith.constant 0 : index
    %13 = vector.load %arg2[%c0_11, %c0_12] : memref<128x128xbf16, #tpu.memory_space<vmem>>, vector<128x128xbf16>
    %cst_13 = arith.constant dense<0.000000e+00> : vector<65x128xf32>
    %14 = tpu.matmul %12, %13, %cst_13 {dimension_numbers = #tpu.dot_dimension_numbers<[1], [0], [0], [1], [0, 0, 1, 1], [], []>} : vector<65x128xbf16>, vector<128x128xbf16>, vector<65x128xf32> -> vector<65x128xf32>
    %c0_14 = arith.constant 0 : index
    %c0_15 = arith.constant 0 : index
    %15 = vector.load %arg3[%c0_14, %c0_15] : memref<1x128xf32, #tpu.memory_space<vmem>>, vector<1x128xf32>
    %16 = vector.broadcast %15 : vector<1x128xf32> to vector<65x128xf32>
    %17 = arith.addf %14, %16 : vector<65x128xf32>
    %c0_16 = arith.constant 0 : index
    %c0_17 = arith.constant 0 : index
    %c0_18 = arith.constant 0 : index
    %18 = vector.load %arg4[%c0_16, %c0_17, %c0_18] : memref<1x65x128xf32, #tpu.memory_space<vmem>>, vector<1x65x128xf32>
    %19 = vector.shape_cast %18 : vector<1x65x128xf32> to vector<65x128xf32>
    %20 = vector.shape_cast %17 : vector<65x128xf32> to vector<1x65x128xf32>
    tpu.vector_store %arg4[%c0_16, %c0_17, %c0_18], %20 {strides = array<i32>} : memref<1x65x128xf32, #tpu.memory_space<vmem>>, vector<1x65x128xf32>,
    return
  }
  func.func @transform_0(%arg0: i32) -> (i32, i32, i32) {
    %c0_i32 = arith.constant 0 : i32
    %c0_i32_0 = arith.constant 0 : i32
    %c0_i32_1 = arith.constant 0 : i32
    return %arg0, %c0_i32, %c0_i32_0 : i32, i32, i32
  }
  func.func @transform_1(%arg0: i32) -> (i32, i32) {
    %c0_i32 = arith.constant 0 : i32
    %c0_i32_0 = arith.constant 0 : i32
    %c0_i32_1 = arith.constant 0 : i32
    return %c0_i32, %c0_i32_0 : i32, i32
  }
  func.func @transform_2(%arg0: i32) -> (i32, i32) {
    %c0_i32 = arith.constant 0 : i32
    %c0_i32_0 = arith.constant 0 : i32
    %c0_i32_1 = arith.constant 0 : i32
    return %c0_i32, %c0_i32_0 : i32, i32
  }
  func.func @transform_3(%arg0: i32) -> (i32, i32, i32) {
    %c0_i32 = arith.constant 0 : i32
    %c0_i32_0 = arith.constant 0 : i32
    %c0_i32_1 = arith.constant 0 : i32
    return %arg0, %c0_i32, %c0_i32_0 : i32, i32, i32
  }
}

</mosaic_0001>

<bundles_post_ra>
// kernel: tpu_custom_call.1
= control target key start
LH: loop header
LB: loop body
LE: loop exit
PB: predicated region body
PF: predicated region fallthrough
CT: control target
= control target key end

     0   :  { %s708_s12 = smov 0   ;;  %s854_s0 = inlined_call_operand.vmem [shape: f32[2,65,128], index: 0, kind: input, shape index: {}]   ;;  %s855_s1 = inlined_call_operand.vmem [shape: bf16[128,128], index: 1, kind: input, shape index: {}]   ;;  %s856_s2 = inlined_call_operand.vmem [shape: f32[1,128], index: 2, kind: input, shape index: {}]   ;;  %s857_s3 = inlined_call_operand.vmem [shape: f32[2,65,128], index: 3, kind: output, shape index: {}]  }
   0x1 LB: > { %s523_s13 = sadd.s32 4294967295, %s683_s12   ;;  %p527_p0 = scmp.ge.s32.totalorder %s683_s12, 1  ;;  %s683_s12 = sphi %s708_s12, %s13_s12  }
   0x2   : > { %p137_p1 = scmp.lt.s32.totalorder %s683_s12, 3 }
   0x4   : > { %p138_p2 = pnand %p527_p0, %p137_p1 }
   0x5   : > { %v664_v0 = vld [vmem:[%s855_s1] sm:$0xff] (!%p138_p2)   ;;  %v685_v1 = vmov (!%p138_p2), 0.0   ;;  %v665_v2 = vld [vmem:[%s855_s1 + $0x8] sm:$0xff] (!%p138_p2)   ;;  %p161_p3 = scmp.lt.s32.totalorder (!%p138_p2), %s523_s13, 1  ;;  %vm686_vm0 = vmmov (!%p138_p2), 0   ;;  %v666_v3 = vld [vmem:[%s855_s1 + $0x10] sm:$0xff] (!%p138_p2)  }
   0x6   : > { %141 = sbr.rel (%p138_p2) target bundleno = 279 (0x117), region = 32  ;;  %600 = vmatprep.subr.bf16.mxu0 (!%p138_p2), %v685_v1  ;;  %636 = vmatprep.subr.bf16.mxu1 (!%p138_p2), %v685_v1  ;;  %v667_v4 = vld [vmem:[%s855_s1 + $0x18] sm:$0xff] (!%p138_p2)   ;;  %vm232_vm1 = vcmask (!%p138_p2), 338944   ;;  %vm227_vm2 = vsmask.f32 (!%p138_p2), 256  ;;  %vm226_vm3 = vcmask (!%p138_p2), 1040384  }
   0x7   : > { %601 = vmatpush3.bf16.msra.mxu0 (!%p138_p2), %v664_v0  ;;  %644 = vmatpush3.bf16.msra.mxu1 (!%p138_p2), %v664_v0  ;;  %vm256_vm4 = vcmask (!%p138_p2), 1027744   ;;  %v229_v24 = vld [vmem:[#allocation2 + $0x20] sm:$0x1] (!%p138_p2)  ;;  %vm233_vm5 = vsmask.f32 (!%p138_p2), 7938  ;;  %v687_v28 = vmov (!%p138_p2), 0   ;;  %vm228_vm6 = vmand (!%p138_p2), %vm226_vm3, %vm227_vm2 }
   0x8   : > { %602 = vmatprep.subr.bf16.mxu0 (!%p138_p2), %v685_v1  ;;  %637 = vmatprep.subr.bf16.mxu1 (!%p138_p2), %v685_v1  ;;  %v668_v26 = vld [vmem:[%s855_s1 + $0x20] sm:$0xff] (!%p138_p2)   ;;  %vm244_vm7 = vcmask (!%p138_p2), 335872   ;;  %vm776_vm8 = vmand (!%p138_p2), %vm232_vm1, %vm233_vm5  ;;  %vm263_vm9 = vcmask (!%p138_p2), 1024672   ;;  %v669_v31 = vld [vmem:[%s855_s1 + $0x28] sm:$0xff] (!%p138_p2)  }
   0x9   : > { %616 = vmatprep.mubr.msk.bf16.mxu0 (!%p138_p2), %vm686_vm0, %v685_v1  ;;  %628 = vmatprep.mubr.msk.bf16.mxu1 (!%p138_p2), %vm686_vm0, %v685_v1  ;;  %vm788_vm10 = vmand (!%p138_p2), %vm244_vm7, %vm227_vm2  ;;  %v670_v36 = vld [vmem:[%s855_s1 + $0x30] sm:$0xff] (!%p138_p2)   ;;  %v671_v43 = vld [vmem:[%s855_s1 + $0x38] sm:$0xff] (!%p138_p2)  }
   0xa   : > { %vm795_vm11 = vmand (!%p138_p2), %vm263_vm9, %vm227_vm2  ;;  %v539_v58 = vld [vmem:[%s856_s2] ss:$0 sm:$0xff] (!%p138_p2) }
   0xb   : > { %603 = vmatpush3.bf16.msra.mxu0 (!%p138_p2), %v665_v2  ;;  %645 = vmatpush3.bf16.msra.mxu1 (!%p138_p2), %v665_v2  ;;  %vm257_vm12 = vmand (!%p138_p2), %vm256_vm4, %vm233_vm5 }
   0xc   : > { %604 = vmatprep.subr.bf16.mxu0 (!%p138_p2), %v685_v1  ;;  %638 = vmatprep.subr.bf16.mxu1 (!%p138_p2), %v685_v1 }
   0xd   : > { %s865_s13 = smov (!%p161_p3, %s523_s13), 1 }
   0xe   : > { %s652_s20 = smul.u32 72, %s865_s13 }
   0xf   : > { %605 = vmatpush3.bf16.msra.mxu0 %v666_v3  ;;  %646 = vmatpush3.bf16.msra.mxu1 %v666_v3 }
  0x10   : > { %s165_s25 = scalar_lea.vmem %s854_s0, %s652_s20  ;;  %606 = vmatprep.subr.bf16.mxu0 %v685_v1  ;;  %639 = vmatprep.subr.bf16.mxu1 %v685_v1  ;;  %s840_s11 = scalar_lea.vmem %s857_s3, %s652_s20 }
  0x11   : > { %v746_v5 = vld [vmem:[%s165_s25] sm:$0xff]  ;;  %v173_v6 = vld [vmem:[%s165_s25 + $0x8] sm:$0xff]  ;;  %v174_v7 = vld [vmem:[%s165_s25 + $0x10] sm:$0xff] }
  0x12   : > { %v175_v8 = vld [vmem:[%s165_s25 + $0x18] sm:$0xff]  ;;  %v567_v9 = vpack.c.bf16 %v173_v6, %v746_v5  ;;  %v176_v10 = vld [vmem:[%s165_s25 + $0x20] sm:$0xff]  ;;  %v177_v12 = vld [vmem:[%s165_s25 + $0x28] sm:$0xff]  ;;  %v556_v15 = vpack.c.bf16 %v173_v6, %v173_v6  ;;  %v557_v27 = vpack.c.bf16 %v174_v7, %v174_v7  ;;  %v555_v44 = vpack.c.bf16 %v746_v5, %v746_v5 }
  0x13   : > { %v558_v11 = vpack.c.bf16 %v175_v8, %v175_v8  ;;  %v178_v13 = vld [vmem:[%s165_s25 + $0x30] sm:$0xff]  ;;  %v751_v14 = vpack.c.bf16 %v176_v10, %v176_v10  ;;  %v179_v16 = vld [vmem:[%s165_s25 + $0x38] sm:$0xff]  ;;  %v180_v17 = vld [vmem:[%s165_s25 + $0x40] sm:$0x1]  ;;  %v560_v18 = vpack.c.bf16 %v177_v12, %v177_v12  ;;  %v572_v19 = vpack.c.bf16 %v175_v8, %v174_v7  ;;  %607 = vmatpush3.bf16.msra.mxu0 %v667_v4 }
  0x14   : > { %568 = vst [vmem:[#allocation2] sm:$0xff] %v567_v9   ;;  %v753_v20 = vpack.c.bf16 %v178_v13, %v178_v13  ;;  %v577_v21 = vpack.c.bf16 %v177_v12, %v176_v10  ;;  %v563_v22 = vpack.c.bf16 %v180_v17, %v180_v17  ;;  %v582_v23 = vpack.c.bf16 %v179_v16, %v178_v13 }
  0x15   : > { %239 = vst.msk [vmem:[#allocation2 + $0x4] sm:$0xf] %vm232_vm1, %v558_v11  ;;  %v562_v25 = vpack.c.bf16 %v179_v16, %v179_v16  ;;  %647 = vmatpush3.bf16.msra.mxu1 %v667_v4  ;;  %584 = vst [vmem:[#allocation2 + $0x8] sm:$0xff] %v572_v19   ;;  %608 = vmatprep.subr.bf16.mxu0 %v685_v1 }
  0x16   : > { %262 = vst.msk [vmem:[#allocation2 + $0x4] sm:$0xf] %vm256_vm4, %v687_v28  ;;  %585 = vst [vmem:[#allocation2 + $0x10] sm:$0xff] %v577_v21   ;;  %640 = vmatprep.subr.bf16.mxu1 %v685_v1  ;;  %v230_v29 = vsel %vm228_vm6, %v563_v22, %v229_v24 }
  0x17   : > { %586 = vst [vmem:[#allocation2 + $0x18] sm:$0xff] %v582_v23   ;;  %240 = vst.msk [vmem:[#allocation2 + $0x8] sm:$0xf] %vm232_vm1, %v751_v14  ;;  %609 = vmatpush3.bf16.msra.mxu0 %v668_v26 }
  0x18   : > { %241 = vst.msk [vmem:[#allocation2 + $0xc] sm:$0xf] %vm232_vm1, %v560_v18  ;;  %242 = vst.msk [vmem:[#allocation2 + $0x10] sm:$0xf] %vm232_vm1, %v753_v20  ;;  %610 = vmatprep.subr.bf16.mxu0 %v685_v1 }
  0x19   : > { %243 = vst.msk [vmem:[#allocation2 + $0x14] sm:$0xf] %vm232_vm1, %v562_v25  ;;  %252 = vst.msk [vmem:[#allocation2 + $0x1c] sm:$0xf] %vm232_vm1, %v687_v28  ;;  %648 = vmatpush3.bf16.msra.mxu1 %v668_v26 }
  0x1a   : > { %271 = vst.msk [vmem:[#allocation2 + $0xc] sm:$0xf] %vm256_vm4, %v556_v15  ;;  %231 = vst [vmem:[#allocation2 + $0x20] sm:$0x1] %v230_v29  ;;  %641 = vmatprep.subr.bf16.mxu1 %v685_v1 }
  0x1b   : > { %272 = vst.msk [vmem:[#allocation2 + $0x10] sm:$0xf] %vm256_vm4, %v557_v27  ;;  %273 = vst.msk [vmem:[#allocation2 + $0x14] sm:$0xf] %vm256_vm4, %v558_v11  ;;  %v235_v32 = vld [vmem:[#allocation2] sm:$0xf]  ;;  %611 = vmatpush3.bf16.msra.mxu0 %v669_v31 }
  0x1c   : > { %275 = vst.msk [vmem:[#allocation2 + $0x1c] sm:$0xf] %vm256_vm4, %v560_v18  ;;  %v236_v34 = vsel %vm776_vm8, %v557_v27, %v235_v32  ;;  %612 = vmatprep.subr.bf16.mxu0 %v685_v1 }
  0x1d   : > { %237 = vst [vmem:[#allocation2] sm:$0xf] %v236_v34  ;;  %649 = vmatpush3.bf16.msra.mxu1 %v669_v31 }
  0x1e   : > { %v246_v37 = vld [vmem:[#allocation2 + $0x18] sm:$0x1]  ;;  %v265_v38 = vld [vmem:[#allocation2 + $0x8] sm:$0x1]  ;;  %642 = vmatprep.subr.bf16.mxu1 %v685_v1 }
  0x1f   : > { %v247_v39 = vsel %vm788_vm10, %v563_v22, %v246_v37  ;;  %v266_v40 = vsel %vm795_vm11, 0, %v265_v38  ;;  %613 = vmatpush3.bf16.msra.mxu0 %v670_v36 }
  0x20   : > { %248 = vst [vmem:[#allocation2 + $0x18] sm:$0x1] %v247_v39  ;;  %267 = vst [vmem:[#allocation2 + $0x8] sm:$0x1] %v266_v40  ;;  %614 = vmatprep.subr.bf16.mxu0 %v685_v1 }
  0x21   : > { %v253_v41 = vld [vmem:[#allocation2 + $0x20] sm:$0x1]  ;;  %650 = vmatpush3.bf16.msra.mxu1 %v670_v36 }
  0x22   : > { %v254_v42 = vsel %vm788_vm10, 0, %v253_v41  ;;  %643 = vmatprep.subr.bf16.mxu1 %v685_v1  ;;  %v676_v57 = vld [vmem:[#allocation2 + $0x10] sm:$0xff]  }
  0x23   : > { %255 = vst [vmem:[#allocation2 + $0x20] sm:$0x1] %v254_v42  ;;  %615 = vmatpush3.bf16.msra.mxu0 %v671_v43 }
  0x24   : > { %v258_v45 = vld [vmem:[#allocation2] sm:$0xf] }
  0x25   : > { %v259_v46 = vsel %vm257_vm12, 0, %v258_v45  ;;  %651 = vmatpush3.bf16.msra.mxu1 %v671_v43 }
  0x26   : > { %260 = vst [vmem:[#allocation2] sm:$0xf] %v259_v46 }
  0x27   : > { %v249_v47 = vld [vmem:[#allocation2 + $0x18] sm:$0xf]  ;;  %v268_v48 = vld [vmem:[#allocation2 + $0x8] sm:$0xf] }
  0x28   : > { %v250_v49 = vsel %vm776_vm8, 0, %v249_v47  ;;  %v269_v50 = vsel %vm257_vm12, %v555_v44, %v268_v48 }
  0x29   : > { %251 = vst [vmem:[#allocation2 + $0x18] sm:$0xf] %v250_v49  ;;  %270 = vst [vmem:[#allocation2 + $0x8] sm:$0xf] %v269_v50 }
  0x2a   : > { %v276_v51 = vld [vmem:[#allocation2 + $0x20] sm:$0x1]  ;;  %274 = vst.msk [vmem:[#allocation2 + $0x18] sm:$0xf] %vm256_vm4, %v751_v14 }
  0x2b   : > { %v277_v52 = vsel %vm795_vm11, %v753_v20, %v276_v51 }
  0x2c   : > { %278 = vst [vmem:[#allocation2 + $0x20] sm:$0x1] %v277_v52 }
  0x2d   : > { %v672_v53 = vld [vmem:[#allocation2] sm:$0xff]  }
  0x2e   : > { %617 = vmatmul.mubr.bf16.vlgmr.msra.gmra.mrb[0].mxu0 %v672_v53 }
  0x2f   : > { %620 = vmatprep.mubr.msk.bf16.mxu0 %vm686_vm0, %v685_v1 }
  0x30   : > { %v674_v55 = vld [vmem:[#allocation2 + $0x8] sm:$0xff]  }
  0x31   : > { %v673_v54 = vld [vmem:[#allocation2 + $0x18] sm:$0xff]  }
  0x32   : > { %629 = vmatmul.mubr.bf16.vlgmr.msra.gmra.mrb[0].mxu1 %v673_v54 }
  0x33   : > { %632 = vmatprep.mubr.msk.bf16.mxu1 %vm686_vm0, %v685_v1  ;;  %v675_v56 = vld [vmem:[#allocation2 + $0x20] ss:$0 sps:$4 sm:$0x11]  }
  0x36   : > { %621 = vmatmul.mubr.bf16.gmra.mrb[4].mxu0 %v674_v55 }
  0x37   : > { %624 = vmatprep.mubr.msk.bf16.mxu0 %vm686_vm0, %v685_v1 }
  0x3a   : > { %633 = vmatmul.mubr.bf16.gmra.mrb[4].mxu1 %v675_v56 }
  0x3e   : > { %625 = vmatmul.mubr.bf16.gmra.mrb[8].mxu0 %v676_v57 }
 0x101   : > { %v421_v59 = vpop.f32.mrb[0].mxu0 }
 0x102   : > { %v422_v60 = vadd.f32 %v539_v58, %v421_v59  ;;  %v618_v61 = vpop.f32.mrb[1].mxu0 }
 0x103   : > { %v424_v62 = vpop.f32.mrb[2].mxu0 }
 0x104   : > { %459 = vst [vmem:[%s840_s11] sm:$0xff] %v422_v60  ;;  %v425_v63 = vadd.f32 %v539_v58, %v424_v62  ;;  %v619_v0 = vpop.f32.mrb[3].mxu0 }
 0x105   : > { %v445_v1 = vpop.f32.mrb[0].mxu1 }
 0x106   : > { %460 = vst [vmem:[%s840_s11 + $0x8] sm:$0xff] %v425_v63  ;;  %v446_v2 = vadd.f32 %v539_v58, %v445_v1  ;;  %v630_v3 = vpop.f32.mrb[1].mxu1 }
 0x107   : > { %v448_v4 = vpop.f32.mrb[2].mxu1 }
 0x108   : > { %465 = vst [vmem:[%s840_s11 + $0x30] sm:$0xff] %v446_v2  ;;  %v449_v5 = vadd.f32 %v539_v58, %v448_v4  ;;  %v631_v6 = vpop.f32.mrb[3].mxu1 }
 0x109   : > { %v429_v7 = vpop.f32.mrb[4].mxu0 }
 0x10a   : > { %v430_v8 = vadd.f32 %v539_v58, %v429_v7  ;;  %v622_v9 = vpop.f32.mrb[5].mxu0  ;;  %466 = vst [vmem:[%s840_s11 + $0x38] sm:$0xff] %v449_v5 }
 0x10b   : > { %v432_v10 = vpop.f32.mrb[6].mxu0 }
 0x10c   : > { %461 = vst [vmem:[%s840_s11 + $0x10] sm:$0xff] %v430_v8  ;;  %v433_v11 = vadd.f32 %v539_v58, %v432_v10  ;;  %v623_v12 = vpop.f32.mrb[7].mxu0 }
 0x10d   : > { %v453_v13 = vpop.f32.mrb[4].mxu1 }
 0x10e   : > { %462 = vst [vmem:[%s840_s11 + $0x18] sm:$0xff] %v433_v11  ;;  %v454_v14 = vadd.f32 %v539_v58, %v453_v13  ;;  %v634_v15 = vpop.f32.mrb[5].mxu1 }
 0x10f   : > { %v456_v16 = vpop.f32.mrb[6].mxu1 }
 0x110   : > { %467 = vst [vmem:[%s840_s11 + $0x40] sm:$0x1] %v454_v14  ;;  %v635_v17 = vpop.f32.mrb[7].mxu1 }
 0x111   : > { %v437_v18 = vpop.f32.mrb[8].mxu0 }
 0x112   : > { %v438_v19 = vadd.f32 %v539_v58, %v437_v18  ;;  %v626_v20 = vpop.f32.mrb[9].mxu0 }
 0x113   : > { %v440_v21 = vpop.f32.mrb[10].mxu0 }
 0x114   : > { %463 = vst [vmem:[%s840_s11 + $0x20] sm:$0xff] %v438_v19  ;;  %v441_v22 = vadd.f32 %v539_v58, %v440_v21  ;;  %v627_v23 = vpop.f32.mrb[11].mxu0 }
 0x116   : > { %464 = vst [vmem:[%s840_s11 + $0x28] sm:$0xff] %v441_v22 }
 0x117 PF: > { %s13_s12 = sadd.s32 1, %s683_s12  }
 0x118   : > { %p10_p4 = scmp.ge.s32.totalorder %s13_s12, 4  }
 0x11a   :  { %12 = sbr.rel (!%p10_p4) target bundleno = 1 (0x1), region = 62 }

</bundles_post_ra>
